<compile_context>
chip_gen: v5e
topology: v5e:2x2
jax: 0.10.0
libtpu: 0.0.40
codegen_flags: <defaults>
</compile_context>

<pallas_src>
import jax
import jax.numpy as jnp
from jax.experimental import pallas as pl
from jax.experimental.pallas import tpu as pltpu


def channel_pool_kernel(x_ref, o_ref):
    """x_ref: (B_tile, C, HW) VMEM block; o_ref: (B_tile, 2, HW) VMEM block.

    Single fused pass over the channel axis (running max + running sum), so
    the input block is traversed exactly once — this kernel is purely
    HBM/vld-bound, compute is trivial VPU work.
    """
    c_total = x_ref.shape[1]

    x0 = x_ref[:, 0, :].astype(jnp.float32)          # (B_tile, HW)
    running_max = x0
    running_sum = x0
    for c in range(1, c_total):                       # small static unrolled loop
        xc = x_ref[:, c, :].astype(jnp.float32)
        running_max = jnp.maximum(running_max, xc)
        running_sum = running_sum + xc

    o_ref[:, 0, :] = running_max.astype(o_ref.dtype)
    o_ref[:, 1, :] = (running_sum * (1.0 / c_total)).astype(o_ref.dtype)


def _choose_batch_tile(n, c, hw, itemsize, budget_bytes=16 * 1024 * 1024):
    """Largest batch tile whose double-buffered in+out blocks fit the budget.

    budget_bytes is per buffer-set; x2 for double-buffering keeps us under the
    scoped-VMEM request below and safely under v7x's 64 MiB physical VMEM.
    """
    per_img = (c + 2) * hw * itemsize               # one input row + one output row
    bt = max(1, budget_bytes // (2 * per_img))      # 2x: pipeline double-buffering
    bt = int(min(bt, n))
    # v7x has 2 TensorCores sharding the "parallel" grid axis: keep >= 2 steps.
    while bt > 1 and n // bt < 2:
        bt -= 1
    # Use only full blocks (no partial-batch masking needed).
    while n % bt != 0:
        bt -= 1
    return bt


def channel_pool(x):
    """ChannelPool forward: (N, C, H, W) -> (N, 2, H, W) = cat(max_C, mean_C)."""
    n, c, h, w = x.shape
    hw = h * w
    x2 = x.reshape(n, c, hw)                        # lane-dense: last dim = H*W
    b_tile = _choose_batch_tile(n, c, hw, x.dtype.itemsize)
    grid = (n // b_tile,)

    out = pl.pallas_call(
        channel_pool_kernel,
        out_shape=jax.ShapeDtypeStruct((n, 2, hw), x.dtype),
        grid_spec=pltpu.PrefetchScalarGridSpec(
            num_scalar_prefetch=0,
            grid=grid,
            in_specs=[pl.BlockSpec((b_tile, c, hw), lambda b: (b, 0, 0))],
            out_specs=pl.BlockSpec((b_tile, 2, hw), lambda b: (b, 0, 0)),
        ),
        compiler_params=pltpu.CompilerParams(
            dimension_semantics=("parallel",),
            # Above the 16/32 MiB scoped defaults so large B_tile blocks
            # compile on v5e/v6e, but under v7x's 64 MiB physical VMEM.
            vmem_limit_bytes=48 * 1024 * 1024,
        ),
    )(x2)
    return out.reshape(n, 2, h, w)


def channel_pool_reference(x):
    """Pure-JAX reference matching the PyTorch ChannelPool forward."""
    return jnp.concatenate(
        [jnp.max(x, axis=1, keepdims=True), jnp.mean(x, axis=1, keepdims=True)],
        axis=1,
    )


if __name__ == "__main__":
    key = jax.random.PRNGKey(0)

    N, C, H, W = 2, 4, 16, 16
    x = jax.random.normal(key, (N, C, H, W), dtype=jnp.float32)

    out = channel_pool(x)
    out = jax.block_until_ready(out)

    ref = channel_pool_reference(x)
    assert out.shape == (N, 2, H, W) and out.dtype == x.dtype
    assert jnp.allclose(out, ref, atol=1e-6, rtol=1e-6), "mismatch vs reference"

    print("KERNEL_OK")
</pallas_src>

<mosaic_0001>
module attributes {stable_mosaic.version = 11 : i64} {
  func.func @channel_pool_kernel(%arg0: i32, %arg1: memref<1x4x256xf32, #tpu.memory_space<vmem>>, %arg2: memref<1x2x256xf32, #tpu.memory_space<vmem>>) attributes {dimension_semantics = [#tpu.dimension_semantics<parallel>], iteration_bounds = array<i64: 2>, scalar_prefetch = 0 : i64, scratch_operands = 0 : i64, tpu.core_type = #tpu.core_type<tc>, window_params = [{transform_indices = @transform_0, window_bounds = array<i64: 1, 4, 256>}, {transform_indices = @transform_1, window_bounds = array<i64: 1, 2, 256>}]} {
    %c0 = arith.constant 0 : index
    %c0_0 = arith.constant 0 : index
    %c0_1 = arith.constant 0 : index
    %0 = vector.load %arg1[%c0, %c0_0, %c0_1] : memref<1x4x256xf32, #tpu.memory_space<vmem>>, vector<1x1x256xf32>
    %1 = vector.shape_cast %0 : vector<1x1x256xf32> to vector<1x256xf32>
    %c0_2 = arith.constant 0 : index
    %c1 = arith.constant 1 : index
    %c0_3 = arith.constant 0 : index
    %2 = vector.load %arg1[%c0_2, %c1, %c0_3] : memref<1x4x256xf32, #tpu.memory_space<vmem>>, vector<1x1x256xf32>
    %3 = vector.shape_cast %2 : vector<1x1x256xf32> to vector<1x256xf32>
    %4 = arith.maximumf %1, %3 : vector<1x256xf32>
    %5 = arith.addf %1, %3 : vector<1x256xf32>
    %c0_4 = arith.constant 0 : index
    %c2 = arith.constant 2 : index
    %c0_5 = arith.constant 0 : index
    %6 = vector.load %arg1[%c0_4, %c2, %c0_5] : memref<1x4x256xf32, #tpu.memory_space<vmem>>, vector<1x1x256xf32>
    %7 = vector.shape_cast %6 : vector<1x1x256xf32> to vector<1x256xf32>
    %8 = arith.maximumf %4, %7 : vector<1x256xf32>
    %9 = arith.addf %5, %7 : vector<1x256xf32>
    %c0_6 = arith.constant 0 : index
    %c3 = arith.constant 3 : index
    %c0_7 = arith.constant 0 : index
    %10 = vector.load %arg1[%c0_6, %c3, %c0_7] : memref<1x4x256xf32, #tpu.memory_space<vmem>>, vector<1x1x256xf32>
    %11 = vector.shape_cast %10 : vector<1x1x256xf32> to vector<1x256xf32>
    %12 = arith.maximumf %8, %11 : vector<1x256xf32>
    %13 = arith.addf %9, %11 : vector<1x256xf32>
    %c0_8 = arith.constant 0 : index
    %c0_9 = arith.constant 0 : index
    %c0_10 = arith.constant 0 : index
    %14 = vector.load %arg2[%c0_8, %c0_9, %c0_10] : memref<1x2x256xf32, #tpu.memory_space<vmem>>, vector<1x1x256xf32>
    %15 = vector.shape_cast %14 : vector<1x1x256xf32> to vector<1x256xf32>
    %16 = vector.shape_cast %12 : vector<1x256xf32> to vector<1x1x256xf32>
    tpu.vector_store %arg2[%c0_8, %c0_9, %c0_10], %16 {strides = array<i32>} : memref<1x2x256xf32, #tpu.memory_space<vmem>>, vector<1x1x256xf32>,
    %cst = arith.constant 2.500000e-01 : f32
    %17 = vector.broadcast %cst : f32 to vector<1x256xf32>
    %18 = arith.mulf %13, %17 : vector<1x256xf32>
    %c0_11 = arith.constant 0 : index
    %c1_12 = arith.constant 1 : index
    %c0_13 = arith.constant 0 : index
    %19 = vector.load %arg2[%c0_11, %c1_12, %c0_13] : memref<1x2x256xf32, #tpu.memory_space<vmem>>, vector<1x1x256xf32>
    %20 = vector.shape_cast %19 : vector<1x1x256xf32> to vector<1x256xf32>
    %21 = vector.shape_cast %18 : vector<1x256xf32> to vector<1x1x256xf32>
    tpu.vector_store %arg2[%c0_11, %c1_12, %c0_13], %21 {strides = array<i32>} : memref<1x2x256xf32, #tpu.memory_space<vmem>>, vector<1x1x256xf32>,
    return
  }
  func.func @transform_0(%arg0: i32) -> (i32, i32, i32) {
    %c0_i32 = arith.constant 0 : i32
    %c0_i32_0 = arith.constant 0 : i32
    %c0_i32_1 = arith.constant 0 : i32
    return %arg0, %c0_i32, %c0_i32_0 : i32, i32, i32
  }
  func.func @transform_1(%arg0: i32) -> (i32, i32, i32) {
    %c0_i32 = arith.constant 0 : i32
    %c0_i32_0 = arith.constant 0 : i32
    %c0_i32_1 = arith.constant 0 : i32
    return %arg0, %c0_i32, %c0_i32_0 : i32, i32, i32
  }
}

</mosaic_0001>

<bundles_post_ra>
// kernel: tpu_custom_call.1
= control target key start
LH: loop header
LB: loop body
LE: loop exit
PB: predicated region body
PF: predicated region fallthrough
CT: control target
= control target key end

     0   :  { %6 = vsyncpa [#allocation3], 0  ;;  %s545_s0 = inlined_call_operand.hbm [shape: f32[2,4,256], index: 0, kind: input, shape index: {}]   ;;  %s546_s1 = inlined_call_operand.hbm [shape: f32[2,2,256], index: 1, kind: output, shape index: {}]  }
   0x1   :  { %8 = vsyncpa [#allocation3 + $0x1], 0 }
   0x2   :  { %9 = vsyncpa [#allocation4], 0 }
   0x3   :  { %11 = vsyncpa [#allocation4 + $0x1], 0  ;;  %s417_s6 = smov 0   ;;  %s419_s7 = smov 0  }
   0x4   :  { %s421_s8 = smov 0   ;;  %s423_s9 = smov 0  }
   0x5 LB: > { %s438_s10 = sadd.s32 4294967295, %s405_s9   ;;  %s243_s11 = sadd.s32 4294967294, %s405_s9   ;;  %s405_s9 = sphi %s423_s9, %s556_s9   ;;  %s401_s8 = sphi %s421_s8, %s555_s8   ;;  %s397_s7 = sphi %s419_s7, %s554_s7   ;;  %s393_s6 = sphi %s417_s6, %s553_s6  }
   0x6   : > { %s442_s12 = sadd.s32 1, %s405_s9   ;;  %s24_s13 = sadd.s32 1, %s401_s8 }
   0x7   : > { %s21_s14 = ssub.s32 %s405_s9, %s442_s12  ;;  %p31_p0 = scmp.ne.s32.totalorder %s401_s8, %s397_s7 }
   0x8   : > { %p22_p1 = scmp.eq.s32.totalorder %s21_s14, 0  ;;  %p32_p2 = scmp.eq.s32.totalorder %s405_s9, 0 }
   0x9   : > { %p37_p3 = scmp.ne.s32.totalorder %s397_s7, %s393_s6  ;;  %p38_p4 = scmp.eq.s32.totalorder %s438_s10, 0 }
   0xa   : > { %s454_s15 = scalar_select %p22_p1, %s401_s8, %s24_s13  }
   0xb   : > { %p456_p5 = por %p32_p2, %p31_p0  ;;  %p460_p6 = por %p38_p4, %p37_p3 }
   0xc   : > { %p61_p7 = scmp.eq.s32.totalorder %s438_s10, 1  ;;  %p67_p8 = scmp.eq.s32.totalorder %s243_s11, 1 }
   0xd   : > { %p275_p10 = scmp.lt.s32.totalorder %s405_s9, 2  ;;  %s87_s20 = sand.u32 1, %s401_s8  }
   0xe   : > { %p467_p11 = por %p61_p7, %p31_p0  ;;  %p471_p12 = por %p67_p8, %p37_p3 }
   0xf   : > { %s261_s21 = sshll.u32 %s405_s9, 3  ;;  %s246_s22 = sshll.u32 %s87_s20, 3 }
  0x10   : > { %s96_s25 = scalar_lea.hbm %s545_s0, %s261_s21  ;;  %s91_s27 = scalar_lea.vmem [#allocation2], %s246_s22 }
  0x11   : > { %s98_s26 = sshll.u32 %s96_s25, 4  ;;  %s100_s28 = sshll.u32 %s91_s27, 4  ;;  %s99_s26 = int_to_ptr.hbm [resolvable:$true] %s98_s26  ;;  %s101_s28 = int_to_ptr.vmem [resolvable:$true] %s100_s28 }
  0x12   : > { %p482_p13 = pnand %p275_p10, %p456_p5  ;;  %p249_p0 = scmp.ge.s32.totalorder %s405_s9, 1 }
  0x13   : > { %p105_p1 = scmp.lt.s32.totalorder %s405_s9, 3  ;;  %s88_s30 = scalar_lea.sflag [#allocation3], %s87_s20 }
  0x14   : > { %s309_s2 = sshra.s32 %s99_s26, 4  ;;  %p313_p3 = pneg %p482_p13  ;;  %s310_s2 = int_to_ptr.hbm [resolvable:$true] %s309_s2 }
  0x15   : > { %s311_s3 = scalar_lea.hbm %s310_s2, 8  ;;  %s316_s11 = scalar_lea.hbm %s545_s0, 16 }
  0x16   : > { %p312_p2 = scmp.ne.s32.totalorder %s310_s2, %s311_s3  ;;  %p317_p5 = scmp.lt.s32.totalorder %s310_s2, %s545_s0 }
  0x17   : > { %p318_p8 = scmp.lt.s32.totalorder %s316_s11, %s311_s3 }
  0x18   : > { %p314_p4 = pnand %p313_p3, %p312_p2 }
  0x19   : > { %p319_p10 = por %p318_p8, %p317_p5 }
  0x1a   : > { %p315_p7 = pneg %p314_p4 }
  0x1c   : > { %p320_p9 = pnand %p319_p10, %p315_p7 }
  0x1e   : > { %323 = shalt.err (!%p320_p9)
}
  0x1f   : > { %270 = dma.hbm_to_vmem [thread:$0]  (!%p482_p13), %s99_s26, 128, %s101_s28, %s88_s30  }
  0x20   : > { %p106_p2 = pnand %p249_p0, %p105_p1 }
  0x21   : > { %s503_s16 = sand.u32 (!%p106_p2), 1, %s397_s7  }
  0x22   : > { %109 = sbr.rel (%p106_p2) target bundleno = 56 (0x38), region = 24  ;;  %s250_s20 = sshll.u32 (!%p106_p2), %s503_s16, 3 }
  0x23   : > { %s112_s21 = scalar_lea.sflag (!%p106_p2), [#allocation3], %s503_s16  ;;  %s115_s22 = scalar_lea.vmem (!%p106_p2), [#allocation2], %s250_s20 }
  0x27   : > { %384 = dma.done.wait (%p460_p6), %s112_s21, 128  }
  0x28   : > { %386 = vsyncadd (%p460_p6), %s112_s21, 4294967168  ;;  %s251_s23 = sshll.u32 %s503_s16, 2  ;;  %s262_s24 = sshll.u32 %s438_s10, 2  ;;  %v135_v0 = vld [vmem:[%s115_s22] ss:$4 sm:$0x3]  ;;  %v148_v2 = vlaneseq }
  0x29   : > { %v252_v1 = vld [vmem:[%s115_s22 + $0x1] ss:$4 sm:$0x3]  ;;  %v253_v4 = vld [vmem:[%s115_s22 + $0x2] ss:$4 sm:$0x3]  ;;  %s168_s27 = scalar_lea.hbm %s546_s1, %s262_s24 }
  0x2a   : > { %v138_v3 = vmax.f32 %v135_v0, %v252_v1  ;;  %v139_v5 = vadd.f32 %v252_v1, %v135_v0  ;;  %v254_v6 = vld [vmem:[%s115_s22 + $0x3] ss:$4 sm:$0x3]  ;;  %vm150_vm0 = vcmp.lt.s32.totalorder %v148_v2, 256  ;;  %s134_s17 = scalar_lea.vmem [#allocation5], %s251_s23  ;;  %s172_s29 = sshll.u32 %s168_s27, 4  ;;  %s173_s29 = int_to_ptr.hbm [resolvable:$true] %s172_s29 }
  0x2b   : > { %s170_s28 = sshll.u32 %s134_s17, 4  ;;  %s157_s10 = scalar_lea.sflag [#allocation4], %s503_s16  ;;  %s171_s28 = int_to_ptr.vmem [resolvable:$true] %s170_s28 }
  0x2c   : > { %v142_v7 = vmax.f32 %v138_v3, %v253_v4  ;;  %v143_v8 = vadd.f32 %v253_v4, %v139_v5  ;;  %s353_s30 = sshra.s32 %s173_s29, 4  ;;  %s359_s5 = scalar_lea.hbm %s546_s1, 8  ;;  %s354_s30 = int_to_ptr.hbm [resolvable:$true] %s353_s30 }
  0x2d   : > { %s355_s2 = scalar_lea.hbm %s354_s30, 4  ;;  %p360_p0 = scmp.lt.s32.totalorder %s354_s30, %s546_s1 }
  0x2e   : > { %v146_v9 = vmax.f32 %v142_v7, %v254_v6  ;;  %v147_v10 = vadd.f32 %v254_v6, %v143_v8  ;;  %p356_p6 = scmp.ne.s32.totalorder %s354_s30, %s355_s2  ;;  %p361_p1 = scmp.lt.s32.totalorder %s359_s5, %s355_s2 }
  0x30   : > { %152 = vst.msk [vmem:[%s134_s17] ss:$2 sm:$0x3] %vm150_vm0, %v146_v9  ;;  %v153_v11 = vmul.f32 0.25, %v147_v10  ;;  %p357_p9 = pnand %p356_p6, %p467_p11  ;;  %p362_p3 = por %p361_p1, %p360_p0 }
  0x32   : > { %255 = vst.msk [vmem:[%s134_s17 + $0x1] ss:$2 sm:$0x3] %vm150_vm0, %v153_v11  ;;  %p358_p13 = pneg %p357_p9 }
  0x34   : > { %p363_p4 = pnand %p362_p3, %p358_p13 }
  0x36   : > { %366 = shalt.err (!%p363_p4)
}
  0x37   : > { %265 = dma.vmem_to_hbm [thread:$0]  (%p467_p11), %s171_s28, 64, %s173_s29, %s157_s10  }
  0x38 PF: > { %s184_s14 = sand.u32 1, %s393_s6   ;;  %p552_p7 = scmp.ge.s32.totalorder %s405_s9, 2 }
  0x39   : > { %s185_s16 = scalar_lea.sflag [#allocation4], %s184_s14 }
  0x3a   : > { %p272_p5 = pnand %p552_p7, %p471_p12 }
  0x3c   : > { %p273_p8 = pneg %p272_p5 }
  0x3e   : > { %388 = dma.done.wait (%p273_p8), %s185_s16, 64  }
  0x3f   : > { %390 = vsyncadd (%p273_p8), %s185_s16, 4294967232  ;;  %p14_p10 = scmp.ge.s32.totalorder %s442_s12, 4   ;;  %s553_s6 = smov %s397_s7 }
  0x40   : > { %s554_s7 = smov %s401_s8  ;;  %s555_s8 = smov %s454_s15 }
  0x41   : > { %s556_s9 = smov %s442_s12  ;;  %16 = sbr.rel (!%p14_p10) target bundleno = 5 (0x5), region = 73 }
  0x46   :  { %191 = vsyncpa [#allocation3], 1 }
  0x47   :  { %193 = vsyncpa [#allocation3 + $0x1], 1 }
  0x48   :  { %194 = vsyncpa [#allocation4], 1 }
  0x49   :  { %196 = vsyncpa [#allocation4 + $0x1], 1 }

</bundles_post_ra>
